<compile_context>
chip_gen: v5e
topology: v5e:2x2
jax: 0.10.0
libtpu: 0.0.40
codegen_flags: <defaults>
</compile_context>

<pallas_src>
import functools

import jax
import jax.numpy as jnp
from jax.experimental import pallas as pl
from jax.experimental.pallas import tpu as pltpu  # noqa: F401  (TPU backend)


# --------------------------------------------------------------------------
# Fused kernel:  out = relu(x + BatchNorm2d(x))  on an (N, C, H*W) slab.
#   x_ref  : (N, C, HW)  whole tensor in VMEM (HW lane-dense)
#   gb_ref : (1, C, 2)   merged gamma (col 0) / beta (col 1)
#   o_ref  : (N, C, HW)
# Training-mode batch statistics (biased variance), eps = 1e-5.
# --------------------------------------------------------------------------
def _bn_add_relu_kernel(x_ref, gb_ref, o_ref, *, eps):
    x = x_ref[...].astype(jnp.float32)            # (N, C, HW)
    gb = gb_ref[...]                              # (1, C, 2) f32
    gamma = gb[:, :, 0:1]                         # (1, C, 1)
    beta = gb[:, :, 1:2]                          # (1, C, 1)

    inv_cnt = jnp.float32(1.0 / (x.shape[0] * x.shape[2]))

    # Per-channel batch stats: lane reduction then cheap leading-axis reduction.
    s = jnp.sum(jnp.sum(x, axis=2, keepdims=True), axis=0, keepdims=True)
    mean = s * inv_cnt                            # (1, C, 1)
    xc = x - mean
    ss = jnp.sum(jnp.sum(xc * xc, axis=2, keepdims=True), axis=0, keepdims=True)
    var = ss * inv_cnt                            # biased variance, (1, C, 1)

    scale = gamma * jax.lax.rsqrt(var + eps)      # rsqrt on the EUP (free slot)
    y = x + xc * scale + beta                     # x + BN2(x)
    o_ref[...] = jnp.maximum(y, 0.0).astype(o_ref.dtype)


def _fused_bn_add_relu(x3, gb, *, eps=1e-5, donate_input=False):
    """x3: (N, C, H*W) activation slab; gb: (1, C, 2) merged gamma/beta (f32)."""
    N, C, HW = x3.shape
    n_elem = N * C * HW
    cost = pl.CostEstimate(
        flops=8 * n_elem,
        transcendentals=C,
        bytes_accessed=2 * n_elem * x3.dtype.itemsize + gb.size * 4,
    )
    extra = {"input_output_aliases": {0: 0}} if donate_input else {}
    return pl.pallas_call(
        functools.partial(_bn_add_relu_kernel, eps=eps),
        out_shape=jax.ShapeDtypeStruct((N, C, HW), x3.dtype),
        in_specs=[
            pl.BlockSpec((N, C, HW), lambda: (0, 0, 0)),   # full-array block
            pl.BlockSpec((1, C, 2), lambda: (0, 0, 0)),    # merged gamma/beta
        ],
        out_specs=pl.BlockSpec((N, C, HW), lambda: (0, 0, 0)),
        cost_estimate=cost,
        **extra,
    )(x3, gb)


# --------------------------------------------------------------------------
# Full forward pass — output-equivalent to PyTorch `conv_res_block.forward`.
# The conv1/batch1/relu/conv2 branch of the original module is dead code
# (overwritten before use) and is intentionally not executed.
# Requires ch_in == ch_out (as the residual add in the module does).
# --------------------------------------------------------------------------
@jax.jit
def conv_res_block_forward(x_nchw, params):
    N, C, H, W = x_nchw.shape
    # Dimension-merging reshape of the row-major NCHW buffer: a bitcast, so no
    # relayout kernels / extra HBM round trips surround the pallas_call.
    x3 = x_nchw.reshape(N, C, H * W)
    gb = jnp.stack([params["g2"], params["be2"]], axis=-1)    # (C, 2), tiny
    gb = gb.reshape(1, C, 2).astype(jnp.float32)
    out3 = _fused_bn_add_relu(x3, gb, eps=1e-5)
    return out3.reshape(N, C, H, W)                           # bitcast back


# --------------------------------------------------------------------------
if __name__ == "__main__":
    key = jax.random.PRNGKey(0)
    N, C, H, W = 2, 4, 16, 16          # ch_in == ch_out (required by module)
    ks = jax.random.split(key, 9)

    x = jax.random.normal(ks[0], (N, C, H, W), jnp.float32)

    # Full parameter set of the module (conv1/batch1/conv2 params are carried
    # for fidelity but unused — their branch is dead in the forward pass).
    params = dict(
        w1=0.1 * jax.random.normal(ks[1], (3, 3, C, C), jnp.float32),
        b1=0.1 * jax.random.normal(ks[2], (C,), jnp.float32),
        g1=1.0 + 0.1 * jax.random.normal(ks[3], (C,), jnp.float32),
        be1=0.1 * jax.random.normal(ks[4], (C,), jnp.float32),
        w2=0.1 * jax.random.normal(ks[5], (3, 3, C, C), jnp.float32),
        b2=0.1 * jax.random.normal(ks[6], (C,), jnp.float32),
        g2=1.0 + 0.1 * jax.random.normal(ks[7], (C,), jnp.float32),
        be2=0.1 * jax.random.normal(ks[8], (C,), jnp.float32),
    )

    out = jax.block_until_ready(conv_res_block_forward(x, params))
    assert out.shape == (N, C, H, W)

    # ---- correctness check against a pure-JAX reference --------------------
    # Reference: relu(x + BN2(x)), training-mode batch stats, biased variance.
    mean = jnp.mean(x, axis=(0, 2, 3), keepdims=True)
    var = jnp.var(x, axis=(0, 2, 3), keepdims=True)           # biased
    g = params["g2"].reshape(1, C, 1, 1)
    b = params["be2"].reshape(1, C, 1, 1)
    ref = jnp.maximum(x + (x - mean) * jax.lax.rsqrt(var + 1e-5) * g + b, 0.0)
    err = jnp.max(jnp.abs(out - ref))
    assert err < 1e-4, f"output mismatch vs reference: {err}"

    print("KERNEL_OK")
</pallas_src>

<mosaic_0001>
module attributes {stable_mosaic.version = 11 : i64} {
  func.func @_bn_add_relu_kernel(%arg0: memref<2x4x256xf32, #tpu.memory_space<vmem>>, %arg1: memref<1x4x2xf32, #tpu.memory_space<vmem>>, %arg2: memref<2x4x256xf32, #tpu.memory_space<vmem>>) attributes {dimension_semantics = [], scalar_prefetch = 0 : i64, scratch_operands = 0 : i64, tpu.core_type = #tpu.core_type<tc>} {
    %c0 = arith.constant 0 : index
    %c0_0 = arith.constant 0 : index
    %c0_1 = arith.constant 0 : index
    %0 = vector.load %arg0[%c0, %c0_0, %c0_1] : memref<2x4x256xf32, #tpu.memory_space<vmem>>, vector<2x4x256xf32>
    %c0_2 = arith.constant 0 : index
    %c0_3 = arith.constant 0 : index
    %c0_4 = arith.constant 0 : index
    %1 = vector.load %arg1[%c0_2, %c0_3, %c0_4] : memref<1x4x2xf32, #tpu.memory_space<vmem>>, vector<1x4x2xf32>
    %2 = vector.extract_strided_slice %1 {offsets = [0, 0, 0], sizes = [1, 4, 1], strides = [1, 1, 1]} : vector<1x4x2xf32> to vector<1x4x1xf32>
    %3 = vector.extract_strided_slice %1 {offsets = [0, 0, 1], sizes = [1, 4, 1], strides = [1, 1, 1]} : vector<1x4x2xf32> to vector<1x4x1xf32>
    %cst = arith.constant dense<0.000000e+00> : vector<2x4xf32>
    %4 = vector.multi_reduction <add>, %0, %cst [2] : vector<2x4x256xf32> to vector<2x4xf32>
    %5 = vector.shape_cast %4 : vector<2x4xf32> to vector<2x4x1xf32>
    %cst_5 = arith.constant dense<0.000000e+00> : vector<4x1xf32>
    %6 = vector.multi_reduction <add>, %5, %cst_5 [0] : vector<2x4x1xf32> to vector<4x1xf32>
    %7 = vector.shape_cast %6 : vector<4x1xf32> to vector<1x4x1xf32>
    %cst_6 = arith.constant 0.001953125 : f32
    %8 = vector.broadcast %cst_6 : f32 to vector<1x4x1xf32>
    %9 = arith.mulf %7, %8 : vector<1x4x1xf32>
    %10 = vector.broadcast %9 : vector<1x4x1xf32> to vector<2x4x256xf32>
    %11 = arith.subf %0, %10 : vector<2x4x256xf32>
    %12 = arith.mulf %11, %11 : vector<2x4x256xf32>
    %cst_7 = arith.constant dense<0.000000e+00> : vector<2x4xf32>
    %13 = vector.multi_reduction <add>, %12, %cst_7 [2] : vector<2x4x256xf32> to vector<2x4xf32>
    %14 = vector.shape_cast %13 : vector<2x4xf32> to vector<2x4x1xf32>
    %cst_8 = arith.constant dense<0.000000e+00> : vector<4x1xf32>
    %15 = vector.multi_reduction <add>, %14, %cst_8 [0] : vector<2x4x1xf32> to vector<4x1xf32>
    %16 = vector.shape_cast %15 : vector<4x1xf32> to vector<1x4x1xf32>
    %cst_9 = arith.constant 0.001953125 : f32
    %17 = vector.broadcast %cst_9 : f32 to vector<1x4x1xf32>
    %18 = arith.mulf %16, %17 : vector<1x4x1xf32>
    %cst_10 = arith.constant 9.99999974E-6 : f32
    %19 = vector.broadcast %cst_10 : f32 to vector<1x4x1xf32>
    %20 = arith.addf %18, %19 : vector<1x4x1xf32>
    %21 = math.rsqrt %20 : vector<1x4x1xf32>
    %22 = arith.mulf %2, %21 : vector<1x4x1xf32>
    %23 = vector.broadcast %22 : vector<1x4x1xf32> to vector<2x4x256xf32>
    %24 = arith.mulf %11, %23 : vector<2x4x256xf32>
    %25 = arith.addf %0, %24 : vector<2x4x256xf32>
    %26 = vector.broadcast %3 : vector<1x4x1xf32> to vector<2x4x256xf32>
    %27 = arith.addf %25, %26 : vector<2x4x256xf32>
    %cst_11 = arith.constant 0.000000e+00 : f32
    %28 = vector.broadcast %cst_11 : f32 to vector<2x4x256xf32>
    %29 = arith.maximumf %27, %28 : vector<2x4x256xf32>
    %c0_12 = arith.constant 0 : index
    %c0_13 = arith.constant 0 : index
    %c0_14 = arith.constant 0 : index
    %30 = vector.load %arg2[%c0_12, %c0_13, %c0_14] : memref<2x4x256xf32, #tpu.memory_space<vmem>>, vector<2x4x256xf32>
    tpu.vector_store %arg2[%c0_12, %c0_13, %c0_14], %29 {strides = array<i32>} : memref<2x4x256xf32, #tpu.memory_space<vmem>>, vector<2x4x256xf32>,
    return
  }
}

</mosaic_0001>

<bundles_post_ra>
// kernel: conv_res_block_forward.1
= control target key start
LH: loop header
LB: loop body
LE: loop exit
PB: predicated region body
PF: predicated region fallthrough
CT: control target
= control target key end

     0   :  { %vm27_vm0 = vcmask 1043456   ;;  %v131_v13 = vmov 839922192   ;;  %v132_v36 = vmov 0   ;;  %v133_v38 = vmov 1   ;;  %s186_s0 = inlined_call_operand.vmem [shape: f32[2,4,256], index: 0, kind: input, shape index: {}]   ;;  %s187_s1 = inlined_call_operand.vmem [shape: f32[1,4,2], index: 1, kind: input, shape index: {}]   ;;  %s188_s2 = inlined_call_operand.vmem [shape: f32[2,4,256], index: 2, kind: output, shape index: {}]  }
   0x1   :  { %v152_v0 = vld [vmem:[%s186_s0] sm:$0xff]  ;;  %v157_v1 = vld [vmem:[%s186_s0 + $0x8] sm:$0xff]  ;;  %v44_v14 = vunpack.c.l.s4 %v131_v13  ;;  %126 = vset.pattern.permute.xlu2 %v132_v36  ;;  %128 = vset.pattern.permute.xlu0 %v133_v38 }
   0x2   :  { %16 = vst [vmem:[#allocation1] ss:$2 sm:$0xff] %v152_v0  ;;  %v13_v50 = vld [vmem:[%s187_s1] sm:$0xf] }
   0x3   :  { %20 = vst [vmem:[#allocation1 + $0x10] ss:$2 sm:$0xff] %v157_v1  ;;  %v45_v18 = vunpack.c.0.s8 %v44_v14 }
   0x9   :  { %v17_v2 = vld.sshfl [vmem:[#allocation1] sm:$0xff pattern:$0x75316420]  ;;  %v18_v3 = vld.sshfl [vmem:[#allocation1 + $0x8] sm:$0xff pattern:$0x75316420] }
   0xa   :  { %v28_v4 = vsel %vm27_vm0, %v17_v2, 0.0  ;;  %v29_v5 = vsel %vm27_vm0, %v18_v3, 0.0  ;;  %v21_v7 = vld.sshfl [vmem:[#allocation1 + $0x10] sm:$0xff pattern:$0x75316420] }
   0xb   :  { %v30_v6 = vadd.f32 %v29_v5, %v28_v4  ;;  %v22_v8 = vld.sshfl [vmem:[#allocation1 + $0x18] sm:$0xff pattern:$0x75316420]  ;;  %v33_v9 = vsel %vm27_vm0, %v21_v7, 0.0 }
   0xc   :  { %v34_v10 = vsel %vm27_vm0, %v22_v8, 0.0 }
   0xd   :  { %31 = vadd.xlane.f32.xlu0 %v30_v6  ;;  %v35_v11 = vadd.f32 %v34_v10, %v33_v9 }
  0x15   :  { %36 = vadd.xlane.f32.xlu0 %v35_v11 }
  0x80   :  { %v32_v12 = vpop.xlane.xlu0 %31 }
  0x81   :  { %v38_v16 = vsel %vm27_vm0, %v32_v12, 0.0 }
  0x88   :  { %v37_v15 = vpop.xlane.xlu0 %36 }
  0x89   :  { %v39_v17 = vsel %vm27_vm0, %v37_v15, 0.0 }
  0x8a   :  { %v40_v19 = vadd.f32 %v39_v17, %v38_v16 }
  0x8c   :  { %v41_v20 = vmul.f32 0.001953125, %v40_v19 }
  0x8e   :  { %v46_v21 = vperm.slane %v41_v20, %v45_v18 }
  0x90   :  { %v48_v22 = vsub.f32 %v152_v0, %v46_v21  ;;  %v49_v23 = vsub.f32 %v157_v1, %v46_v21 }
  0x92   :  { %v50_v24 = vmul.f32 %v48_v22, %v48_v22  ;;  %v51_v25 = vmul.f32 %v49_v23, %v49_v23 }
  0x94   :  { %54 = vst [vmem:[#allocation1] ss:$2 sm:$0xff] %v50_v24 }
  0x95   :  { %58 = vst [vmem:[#allocation1 + $0x10] ss:$2 sm:$0xff] %v51_v25 }
  0x9b   :  { %v55_v26 = vld.sshfl [vmem:[#allocation1] sm:$0xff pattern:$0x75316420]  ;;  %v56_v27 = vld.sshfl [vmem:[#allocation1 + $0x8] sm:$0xff pattern:$0x75316420] }
  0x9c   :  { %v65_v28 = vsel %vm27_vm0, %v55_v26, 0.0  ;;  %v66_v29 = vsel %vm27_vm0, %v56_v27, 0.0  ;;  %v59_v31 = vld.sshfl [vmem:[#allocation1 + $0x10] sm:$0xff pattern:$0x75316420] }
  0x9d   :  { %v67_v30 = vadd.f32 %v66_v29, %v65_v28  ;;  %v60_v32 = vld.sshfl [vmem:[#allocation1 + $0x18] sm:$0xff pattern:$0x75316420]  ;;  %v70_v33 = vsel %vm27_vm0, %v59_v31, 0.0 }
  0x9e   :  { %v71_v34 = vsel %vm27_vm0, %v60_v32, 0.0 }
  0x9f   :  { %68 = vadd.xlane.f32.xlu1 %v67_v30  ;;  %v72_v35 = vadd.f32 %v71_v34, %v70_v33 }
  0xa7   :  { %73 = vadd.xlane.f32.xlu1 %v72_v35 }
 0x112   :  { %v69_v37 = vpop.xlane.xlu1 %68 }
 0x113   :  { %v75_v40 = vsel %vm27_vm0, %v69_v37, 0.0 }
 0x11a   :  { %v74_v39 = vpop.xlane.xlu1 %73 }
 0x11b   :  { %v76_v41 = vsel %vm27_vm0, %v74_v39, 0.0 }
 0x11c   :  { %v77_v42 = vadd.f32 %v76_v41, %v75_v40 }
 0x11e   :  { %v78_v43 = vmul.f32 0.001953125, %v77_v42 }
 0x120   :  { %v79_v44 = vadd.f32 1e-05, %v78_v43 }
 0x122   :  { %129 = vrsqrt.f32 %v79_v44  ;;  %vm86_vm2 = vweird.f32 %v79_v44 }
 0x128   :  { %v130_v45 = vpop.eup %129 }
 0x129   :  { %v81_v46 = vmul.f32 %v130_v45, %v79_v44  ;;  %vm87_vm1 = vweird.f32 %v130_v45 }
 0x12a   :  { %vm88_vm3 = vmor %vm86_vm2, %vm87_vm1 }
 0x12b   :  { %v82_v47 = vmul.f32 %v130_v45, %v81_v46 }
 0x12d   :  { %v83_v48 = vmul.f32 0.5, %v82_v47 }
 0x12f   :  { %v84_v49 = vsub.f32 1.5, %v83_v48 }
 0x131   :  { %v85_v51 = vmul.f32 %v130_v45, %v84_v49 }
 0x133   :  { %v89_v52 = vsel %vm88_vm3, %v130_v45, %v85_v51 }
 0x134   :  { %v90_v53 = vmul.f32 %v89_v52, %v13_v50 }
 0x136   :  { %93 = vperm.xlu2 %126, %v90_v53  }
 0x13e   :  { %127 = vset.pattern.permute.xlu2 %v133_v38 }
 0x13f   :  { %106 = vperm.xlu2 %127, %v13_v50  }
 0x190   :  { %v94_v54 = vpop.permute.xlu2 %93 }
 0x191   :  { %v98_v55 = vperm.slane %v94_v54, %v45_v18 }
 0x193   :  { %v100_v56 = vmul.f32 %v98_v55, %v48_v22  ;;  %v101_v57 = vmul.f32 %v98_v55, %v49_v23 }
 0x195   :  { %v102_v59 = vadd.f32 %v100_v56, %v152_v0  ;;  %v103_v60 = vadd.f32 %v101_v57, %v157_v1 }
 0x199   :  { %v107_v58 = vpop.permute.xlu2 %106 }
 0x19a   :  { %v111_v61 = vperm.slane %v107_v58, %v45_v18 }
 0x19c   :  { %v113_v62 = vadd.f32 %v111_v61, %v102_v59  ;;  %v114_v63 = vadd.f32 %v111_v61, %v103_v60 }
 0x19e   :  { %v115_v2 = vmax.f32 %v113_v62, 0.0  ;;  %v116_v3 = vmax.f32 %v114_v63, 0.0 }
 0x1a0   :  { %117 = vst [vmem:[%s188_s2] sm:$0xff] %v115_v2 }
 0x1a1   :  { %118 = vst [vmem:[%s188_s2 + $0x8] sm:$0xff] %v116_v3 }

</bundles_post_ra>
